<compile_context>
chip_gen: v7x
topology: tpu7x:2x2x1
jax: 0.10.0
libtpu: 0.0.40
codegen_flags: <defaults>
</compile_context>

<pallas_src>
import numpy as np
import jax
import jax.numpy as jnp
from jax.experimental import pallas as pl
from jax.experimental.pallas import tpu as pltpu

EPS = 1e-5  # nn.BatchNorm1d default


def _make_kernel(p_len, true_count):
    """p_len: padded lane extent (multiple of 128); true_count: N*L (for BN stats)."""
    inv_n = 1.0 / float(true_count)

    def kernel(x_ref, w10_ref, w11_ref, w12_ref, w2_ref, w3_ref, b3_ref,
               g1_ref, be1_ref, g2_ref, be2_ref, lm_ref, rm_ref, valid_ref,
               out_ref):
        f32 = jnp.float32
        lmask = lm_ref[...]       # (1,P) 1.0 where reading position j-1 is valid
        rmask = rm_ref[...]       # (1,P) 1.0 where reading position j+1 is valid
        valid = valid_ref[...]    # (1,P) 1.0 on real (non-padded) lanes

        def taps(a):
            # a[:, j-1] / a[:, j+1] with zeros at batch boundaries & padding.
            left = pltpu.roll(a, 1, axis=1) * lmask
            right = pltpu.roll(a, p_len - 1, axis=1) * rmask
            return left, right

        def bn_relu(h, g, b):
            # BatchNorm1d training-mode stats over (N, L)  == masked lane reduce.
            hv = h * valid
            mu = jnp.sum(hv, axis=1, keepdims=True) * inv_n
            ex2 = jnp.sum(hv * hv, axis=1, keepdims=True) * inv_n
            var = ex2 - mu * mu
            scale = g * jax.lax.rsqrt(var + EPS)          # rsqrt -> EUP slot
            bias = b - mu * scale
            return jnp.maximum(h * scale + bias, 0.0)     # one FMA + max

        # ---- head_1: conv1 (1->32) on the VPU, then BN + ReLU ----------------
        x = x_ref[...]                                     # (1, P)
        xl, xr = taps(x)
        h1 = w10_ref[...] * xl + w11_ref[...] * x + w12_ref[...] * xr   # (32,P)
        h1 = bn_relu(h1, g1_ref[...], be1_ref[...])

        # ---- head_2a: conv2 (32->32) as one (32,96)@(96,P) MXU matmul --------
        h1l, h1r = taps(h1)
        stack1 = jnp.concatenate([h1l, h1, h1r], axis=0)   # (96, P)
        h2 = jnp.dot(w2_ref[...], stack1, preferred_element_type=f32)
        h2 = bn_relu(h2, g2_ref[...], be2_ref[...])

        # ---- head_2b: conv3 (32->32, stride 2, bias) evaluated densely -------
        # (stride-2 output o corresponds to dense position j = 2o; the wrapper
        #  keeps the even positions, which is a free slice on a tiny tensor)
        h2l, h2r = taps(h2)
        stack2 = jnp.concatenate([h2l, h2, h2r], axis=0)   # (96, P)
        h3 = jnp.dot(w3_ref[...], stack2, preferred_element_type=f32) + b3_ref[...]

        # ---- shortcut: MaxPool1d(kernel=2, padding=1, dilation=2) on h1 ------
        # window at output o is {2o-1, 2o+1}; zero fill is exact since h1 >= 0.
        pool = jnp.maximum(h1l, h1r)

        out_ref[...] = h3 + pool

    return kernel


def make_params(key):
    ks = jax.random.split(key, 8)
    f32 = jnp.float32
    return {
        "w1": 0.3 * jax.random.normal(ks[0], (32, 1, 3), f32),   # Conv1d(1,32,3)
        "w2": 0.1 * jax.random.normal(ks[1], (32, 32, 3), f32),  # Conv1d(32,32,3)
        "w3": 0.1 * jax.random.normal(ks[2], (32, 32, 3), f32),  # Conv1d(32,32,3,s=2)
        "b3": 0.1 * jax.random.normal(ks[3], (32,), f32),
        "g1": 1.0 + 0.1 * jax.random.normal(ks[4], (32,), f32),  # BN1 weight
        "be1": 0.1 * jax.random.normal(ks[5], (32,), f32),       # BN1 bias
        "g2": 1.0 + 0.1 * jax.random.normal(ks[6], (32,), f32),  # BN2 weight
        "be2": 0.1 * jax.random.normal(ks[7], (32,), f32),       # BN2 bias
    }


@jax.jit
def head_block_forward(x, params):
    N, Cin, L = x.shape
    assert Cin == 1
    NL = N * L
    P = ((NL + 127) // 128) * 128            # lane-dense padded extent
    Lout = (L - 1) // 2 + 1
    f32 = jnp.float32

    # ---- re-layout operands for the kernel (all cheap, all O(N*L)) ----------
    x_flat = jnp.transpose(x, (1, 0, 2)).reshape(1, NL).astype(f32)
    x2 = jnp.pad(x_flat, ((0, 0), (0, P - NL)))                       # (1, P)
    w1 = params["w1"].astype(f32)                                     # (32,1,3)
    w10, w11, w12 = w1[:, 0, 0:1], w1[:, 0, 1:2], w1[:, 0, 2:3]       # (32,1)
    # fused tap weights: W[co, k*32 + ci] = w[co, ci, k]
    w2f = jnp.transpose(params["w2"], (0, 2, 1)).reshape(32, 96).astype(f32)
    w3f = jnp.transpose(params["w3"], (0, 2, 1)).reshape(32, 96).astype(f32)
    b3 = params["b3"].reshape(32, 1).astype(f32)
    g1 = params["g1"].reshape(32, 1).astype(f32)
    be1 = params["be1"].reshape(32, 1).astype(f32)
    g2 = params["g2"].reshape(32, 1).astype(f32)
    be2 = params["be2"].reshape(32, 1).astype(f32)

    # boundary / padding masks (static constants, folded by XLA)
    pos = np.arange(P)
    real = pos < NL
    posL = pos % L
    lmask = jnp.asarray(((posL != 0) & real).astype(np.float32)).reshape(1, P)
    rmask = jnp.asarray(((posL != L - 1) & real).astype(np.float32)).reshape(1, P)
    valid = jnp.asarray(real.astype(np.float32)).reshape(1, P)

    operands = [x2, w10, w11, w12, w2f, w3f, b3, g1, be1, g2, be2,
                lmask, rmask, valid]

    def full_spec(shape):
        nd = len(shape)
        return pl.BlockSpec(shape, lambda i, _nd=nd: (0,) * _nd)

    # TODO(synk): for large N*L, tile the lane dimension with a real grid
    # (mark it "parallel" for v7x megacore) and accumulate the BatchNorm
    # batch statistics across tiles (two-pass / pl.when-finalised scratch);
    # at these sizes a single lane-dense block is already VMEM-resident.
    out_dense = pl.pallas_call(
        _make_kernel(P, NL),
        out_shape=jax.ShapeDtypeStruct((32, P), f32),
        grid=(1,),
        in_specs=[full_spec(op.shape) for op in operands],
        out_specs=full_spec((32, P)),
        compiler_params=pltpu.CompilerParams(dimension_semantics=("arbitrary",)),
    )(*operands)

    # stride-2 subsample + back to PyTorch NCW layout: (N, 32, Lout)
    out = out_dense[:, :NL].reshape(32, N, L)[:, :, ::2]
    return jnp.transpose(out, (1, 0, 2))


# ---------------- pure-numpy reference (for correctness check) ----------------
def reference_forward(x, p):
    x = np.asarray(x, np.float64)
    w1, w2, w3 = (np.asarray(p[k], np.float64) for k in ("w1", "w2", "w3"))
    b3, g1, be1, g2, be2 = (np.asarray(p[k], np.float64)
                            for k in ("b3", "g1", "be1", "g2", "be2"))

    def conv1d(a, w, b=None, stride=1, pad=1):
        N, Cin, L = a.shape
        Cout, _, K = w.shape
        Lo = (L + 2 * pad - K) // stride + 1
        ap = np.zeros((N, Cin, L + 2 * pad), a.dtype)
        ap[:, :, pad:pad + L] = a
        out = np.zeros((N, Cout, Lo), a.dtype)
        for o in range(Lo):
            seg = ap[:, :, o * stride:o * stride + K]
            out[:, :, o] = np.einsum('nik,oik->no', seg, w)
        if b is not None:
            out = out + b[None, :, None]
        return out

    def bn_relu(h, g, b):
        mu = h.mean(axis=(0, 2), keepdims=True)
        var = ((h - mu) ** 2).mean(axis=(0, 2), keepdims=True)
        hn = (h - mu) / np.sqrt(var + EPS)
        return np.maximum(g[None, :, None] * hn + b[None, :, None], 0.0)

    def maxpool(h):  # kernel=2, stride=2, padding=1, dilation=2
        N, C, L = h.shape
        Lo = (L + 2 - 2 - 1) // 2 + 1
        hp = np.full((N, C, L + 2), -np.inf, h.dtype)
        hp[:, :, 1:1 + L] = h
        out = np.empty((N, C, Lo), h.dtype)
        for o in range(Lo):
            out[:, :, o] = np.maximum(hp[:, :, 2 * o], hp[:, :, 2 * o + 2])
        return out

    h1 = bn_relu(conv1d(x, w1), g1, be1)
    h2 = bn_relu(conv1d(h1, w2), g2, be2)
    h3 = conv1d(h2, w3, b=b3, stride=2, pad=1)
    return h3 + maxpool(h1)


if __name__ == "__main__":
    key = jax.random.PRNGKey(0)
    kx, kp = jax.random.split(key)
    N, L = 2, 16
    x = jax.random.normal(kx, (N, 1, L), jnp.float32)
    params = make_params(kp)

    out = jax.block_until_ready(head_block_forward(x, params))

    ref = reference_forward(np.asarray(x),
                            jax.tree_util.tree_map(np.asarray, params))
    assert out.shape == (N, 32, (L - 1) // 2 + 1), out.shape
    np.testing.assert_allclose(np.asarray(out), ref, rtol=1e-3, atol=1e-3)
    print("KERNEL_OK")
</pallas_src>

<mosaic_0001>
module attributes {stable_mosaic.version = 11 : i64} {
  func.func @kernel(%arg0: i32, %arg1: memref<1x128xf32, #tpu.memory_space<vmem>>, %arg2: memref<32x1xf32, #tpu.memory_space<vmem>>, %arg3: memref<32x1xf32, #tpu.memory_space<vmem>>, %arg4: memref<32x1xf32, #tpu.memory_space<vmem>>, %arg5: memref<32x96xf32, #tpu.memory_space<vmem>>, %arg6: memref<32x96xf32, #tpu.memory_space<vmem>>, %arg7: memref<32x1xf32, #tpu.memory_space<vmem>>, %arg8: memref<32x1xf32, #tpu.memory_space<vmem>>, %arg9: memref<32x1xf32, #tpu.memory_space<vmem>>, %arg10: memref<32x1xf32, #tpu.memory_space<vmem>>, %arg11: memref<32x1xf32, #tpu.memory_space<vmem>>, %arg12: memref<1x128xf32, #tpu.memory_space<vmem>>, %arg13: memref<1x128xf32, #tpu.memory_space<vmem>>, %arg14: memref<1x128xf32, #tpu.memory_space<vmem>>, %arg15: memref<32x128xf32, #tpu.memory_space<vmem>>) attributes {dimension_semantics = [#tpu.dimension_semantics<arbitrary>], iteration_bounds = array<i64: 1>, scalar_prefetch = 0 : i64, scratch_operands = 0 : i64, tpu.core_type = #tpu.core_type<tc>, window_params = [{pipeline_mode = #tpu.pipeline_mode<synchronous>, transform_indices = @transform_0, window_bounds = array<i64: 1, 128>}, {pipeline_mode = #tpu.pipeline_mode<synchronous>, transform_indices = @transform_1, window_bounds = array<i64: 32, 1>}, {pipeline_mode = #tpu.pipeline_mode<synchronous>, transform_indices = @transform_2, window_bounds = array<i64: 32, 1>}, {pipeline_mode = #tpu.pipeline_mode<synchronous>, transform_indices = @transform_3, window_bounds = array<i64: 32, 1>}, {pipeline_mode = #tpu.pipeline_mode<synchronous>, transform_indices = @transform_4, window_bounds = array<i64: 32, 96>}, {pipeline_mode = #tpu.pipeline_mode<synchronous>, transform_indices = @transform_5, window_bounds = array<i64: 32, 96>}, {pipeline_mode = #tpu.pipeline_mode<synchronous>, transform_indices = @transform_6, window_bounds = array<i64: 32, 1>}, {pipeline_mode = #tpu.pipeline_mode<synchronous>, transform_indices = @transform_7, window_bounds = array<i64: 32, 1>}, {pipeline_mode = #tpu.pipeline_mode<synchronous>, transform_indices = @transform_8, window_bounds = array<i64: 32, 1>}, {pipeline_mode = #tpu.pipeline_mode<synchronous>, transform_indices = @transform_9, window_bounds = array<i64: 32, 1>}, {pipeline_mode = #tpu.pipeline_mode<synchronous>, transform_indices = @transform_10, window_bounds = array<i64: 32, 1>}, {pipeline_mode = #tpu.pipeline_mode<synchronous>, transform_indices = @transform_11, window_bounds = array<i64: 1, 128>}, {pipeline_mode = #tpu.pipeline_mode<synchronous>, transform_indices = @transform_12, window_bounds = array<i64: 1, 128>}, {pipeline_mode = #tpu.pipeline_mode<synchronous>, transform_indices = @transform_13, window_bounds = array<i64: 1, 128>}, {pipeline_mode = #tpu.pipeline_mode<synchronous>, transform_indices = @transform_14, window_bounds = array<i64: 32, 128>}]} {
    %c0 = arith.constant 0 : index
    %c0_0 = arith.constant 0 : index
    %0 = vector.load %arg12[%c0, %c0_0] : memref<1x128xf32, #tpu.memory_space<vmem>>, vector<1x128xf32>
    %c0_1 = arith.constant 0 : index
    %c0_2 = arith.constant 0 : index
    %1 = vector.load %arg13[%c0_1, %c0_2] : memref<1x128xf32, #tpu.memory_space<vmem>>, vector<1x128xf32>
    %c0_3 = arith.constant 0 : index
    %c0_4 = arith.constant 0 : index
    %2 = vector.load %arg14[%c0_3, %c0_4] : memref<1x128xf32, #tpu.memory_space<vmem>>, vector<1x128xf32>
    %c0_5 = arith.constant 0 : index
    %c0_6 = arith.constant 0 : index
    %3 = vector.load %arg1[%c0_5, %c0_6] : memref<1x128xf32, #tpu.memory_space<vmem>>, vector<1x128xf32>
    %c1_i32 = arith.constant 1 : i32
    %4 = tpu.dynamic_rotate %3 by %c1_i32 dim 1 : vector<1x128xf32>, i32 -> vector<1x128xf32>
    %5 = arith.mulf %4, %0 : vector<1x128xf32>
    %c127_i32 = arith.constant 127 : i32
    %6 = tpu.dynamic_rotate %3 by %c127_i32 dim 1 : vector<1x128xf32>, i32 -> vector<1x128xf32>
    %7 = arith.mulf %6, %1 : vector<1x128xf32>
    %c0_7 = arith.constant 0 : index
    %c0_8 = arith.constant 0 : index
    %8 = vector.load %arg2[%c0_7, %c0_8] : memref<32x1xf32, #tpu.memory_space<vmem>>, vector<32x1xf32>
    %9 = vector.broadcast %8 : vector<32x1xf32> to vector<32x128xf32>
    %10 = vector.broadcast %5 : vector<1x128xf32> to vector<32x128xf32>
    %11 = arith.mulf %9, %10 : vector<32x128xf32>
    %c0_9 = arith.constant 0 : index
    %c0_10 = arith.constant 0 : index
    %12 = vector.load %arg3[%c0_9, %c0_10] : memref<32x1xf32, #tpu.memory_space<vmem>>, vector<32x1xf32>
    %13 = vector.broadcast %12 : vector<32x1xf32> to vector<32x128xf32>
    %14 = vector.broadcast %3 : vector<1x128xf32> to vector<32x128xf32>
    %15 = arith.mulf %13, %14 : vector<32x128xf32>
    %16 = arith.addf %11, %15 : vector<32x128xf32>
    %c0_11 = arith.constant 0 : index
    %c0_12 = arith.constant 0 : index
    %17 = vector.load %arg4[%c0_11, %c0_12] : memref<32x1xf32, #tpu.memory_space<vmem>>, vector<32x1xf32>
    %18 = vector.broadcast %17 : vector<32x1xf32> to vector<32x128xf32>
    %19 = vector.broadcast %7 : vector<1x128xf32> to vector<32x128xf32>
    %20 = arith.mulf %18, %19 : vector<32x128xf32>
    %21 = arith.addf %16, %20 : vector<32x128xf32>
    %c0_13 = arith.constant 0 : index
    %c0_14 = arith.constant 0 : index
    %22 = vector.load %arg8[%c0_13, %c0_14] : memref<32x1xf32, #tpu.memory_space<vmem>>, vector<32x1xf32>
    %c0_15 = arith.constant 0 : index
    %c0_16 = arith.constant 0 : index
    %23 = vector.load %arg9[%c0_15, %c0_16] : memref<32x1xf32, #tpu.memory_space<vmem>>, vector<32x1xf32>
    %24 = vector.broadcast %2 : vector<1x128xf32> to vector<32x128xf32>
    %25 = arith.mulf %21, %24 : vector<32x128xf32>
    %cst = arith.constant dense<0.000000e+00> : vector<32xf32>
    %26 = vector.multi_reduction <add>, %25, %cst [1] : vector<32x128xf32> to vector<32xf32>
    %27 = vector.shape_cast %26 : vector<32xf32> to vector<32x1xf32>
    %cst_17 = arith.constant 3.125000e-02 : f32
    %28 = vector.broadcast %cst_17 : f32 to vector<32x1xf32>
    %29 = arith.mulf %27, %28 : vector<32x1xf32>
    %30 = arith.mulf %25, %25 : vector<32x128xf32>
    %cst_18 = arith.constant dense<0.000000e+00> : vector<32xf32>
    %31 = vector.multi_reduction <add>, %30, %cst_18 [1] : vector<32x128xf32> to vector<32xf32>
    %32 = vector.shape_cast %31 : vector<32xf32> to vector<32x1xf32>
    %cst_19 = arith.constant 3.125000e-02 : f32
    %33 = vector.broadcast %cst_19 : f32 to vector<32x1xf32>
    %34 = arith.mulf %32, %33 : vector<32x1xf32>
    %35 = arith.mulf %29, %29 : vector<32x1xf32>
    %36 = arith.subf %34, %35 : vector<32x1xf32>
    %cst_20 = arith.constant 9.99999974E-6 : f32
    %37 = vector.broadcast %cst_20 : f32 to vector<32x1xf32>
    %38 = arith.addf %36, %37 : vector<32x1xf32>
    %39 = math.rsqrt %38 : vector<32x1xf32>
    %40 = arith.mulf %22, %39 : vector<32x1xf32>
    %41 = arith.mulf %29, %40 : vector<32x1xf32>
    %42 = arith.subf %23, %41 : vector<32x1xf32>
    %43 = vector.broadcast %40 : vector<32x1xf32> to vector<32x128xf32>
    %44 = arith.mulf %21, %43 : vector<32x128xf32>
    %45 = vector.broadcast %42 : vector<32x1xf32> to vector<32x128xf32>
    %46 = arith.addf %44, %45 : vector<32x128xf32>
    %cst_21 = arith.constant 0.000000e+00 : f32
    %47 = vector.broadcast %cst_21 : f32 to vector<32x128xf32>
    %48 = arith.maximumf %46, %47 : vector<32x128xf32>
    %c1_i32_22 = arith.constant 1 : i32
    %49 = tpu.dynamic_rotate %48 by %c1_i32_22 dim 1 : vector<32x128xf32>, i32 -> vector<32x128xf32>
    %50 = vector.broadcast %0 : vector<1x128xf32> to vector<32x128xf32>
    %51 = arith.mulf %49, %50 : vector<32x128xf32>
    %c127_i32_23 = arith.constant 127 : i32
    %52 = tpu.dynamic_rotate %48 by %c127_i32_23 dim 1 : vector<32x128xf32>, i32 -> vector<32x128xf32>
    %53 = vector.broadcast %1 : vector<1x128xf32> to vector<32x128xf32>
    %54 = arith.mulf %52, %53 : vector<32x128xf32>
    %55 = tpu.concatenate %51, %48, %54 in 0 : vector<32x128xf32>, vector<32x128xf32>, vector<32x128xf32> -> vector<96x128xf32>
    %c0_24 = arith.constant 0 : index
    %c0_25 = arith.constant 0 : index
    %56 = vector.load %arg5[%c0_24, %c0_25] : memref<32x96xf32, #tpu.memory_space<vmem>>, vector<32x96xf32>
    %cst_26 = arith.constant dense<0.000000e+00> : vector<32x128xf32>
    %57 = tpu.matmul %56, %55, %cst_26 {dimension_numbers = #tpu.dot_dimension_numbers<[1], [0], [0], [1], [0, 0, 1, 1], [], []>} : vector<32x96xf32>, vector<96x128xf32>, vector<32x128xf32> -> vector<32x128xf32>
    %c0_27 = arith.constant 0 : index
    %c0_28 = arith.constant 0 : index
    %58 = vector.load %arg10[%c0_27, %c0_28] : memref<32x1xf32, #tpu.memory_space<vmem>>, vector<32x1xf32>
    %c0_29 = arith.constant 0 : index
    %c0_30 = arith.constant 0 : index
    %59 = vector.load %arg11[%c0_29, %c0_30] : memref<32x1xf32, #tpu.memory_space<vmem>>, vector<32x1xf32>
    %60 = vector.broadcast %2 : vector<1x128xf32> to vector<32x128xf32>
    %61 = arith.mulf %57, %60 : vector<32x128xf32>
    %cst_31 = arith.constant dense<0.000000e+00> : vector<32xf32>
    %62 = vector.multi_reduction <add>, %61, %cst_31 [1] : vector<32x128xf32> to vector<32xf32>
    %63 = vector.shape_cast %62 : vector<32xf32> to vector<32x1xf32>
    %cst_32 = arith.constant 3.125000e-02 : f32
    %64 = vector.broadcast %cst_32 : f32 to vector<32x1xf32>
    %65 = arith.mulf %63, %64 : vector<32x1xf32>
    %66 = arith.mulf %61, %61 : vector<32x128xf32>
    %cst_33 = arith.constant dense<0.000000e+00> : vector<32xf32>
    %67 = vector.multi_reduction <add>, %66, %cst_33 [1] : vector<32x128xf32> to vector<32xf32>
    %68 = vector.shape_cast %67 : vector<32xf32> to vector<32x1xf32>
    %cst_34 = arith.constant 3.125000e-02 : f32
    %69 = vector.broadcast %cst_34 : f32 to vector<32x1xf32>
    %70 = arith.mulf %68, %69 : vector<32x1xf32>
    %71 = arith.mulf %65, %65 : vector<32x1xf32>
    %72 = arith.subf %70, %71 : vector<32x1xf32>
    %cst_35 = arith.constant 9.99999974E-6 : f32
    %73 = vector.broadcast %cst_35 : f32 to vector<32x1xf32>
    %74 = arith.addf %72, %73 : vector<32x1xf32>
    %75 = math.rsqrt %74 : vector<32x1xf32>
    %76 = arith.mulf %58, %75 : vector<32x1xf32>
    %77 = arith.mulf %65, %76 : vector<32x1xf32>
    %78 = arith.subf %59, %77 : vector<32x1xf32>
    %79 = vector.broadcast %76 : vector<32x1xf32> to vector<32x128xf32>
    %80 = arith.mulf %57, %79 : vector<32x128xf32>
    %81 = vector.broadcast %78 : vector<32x1xf32> to vector<32x128xf32>
    %82 = arith.addf %80, %81 : vector<32x128xf32>
    %cst_36 = arith.constant 0.000000e+00 : f32
    %83 = vector.broadcast %cst_36 : f32 to vector<32x128xf32>
    %84 = arith.maximumf %82, %83 : vector<32x128xf32>
    %c1_i32_37 = arith.constant 1 : i32
    %85 = tpu.dynamic_rotate %84 by %c1_i32_37 dim 1 : vector<32x128xf32>, i32 -> vector<32x128xf32>
    %86 = vector.broadcast %0 : vector<1x128xf32> to vector<32x128xf32>
    %87 = arith.mulf %85, %86 : vector<32x128xf32>
    %c127_i32_38 = arith.constant 127 : i32
    %88 = tpu.dynamic_rotate %84 by %c127_i32_38 dim 1 : vector<32x128xf32>, i32 -> vector<32x128xf32>
    %89 = vector.broadcast %1 : vector<1x128xf32> to vector<32x128xf32>
    %90 = arith.mulf %88, %89 : vector<32x128xf32>
    %91 = tpu.concatenate %87, %84, %90 in 0 : vector<32x128xf32>, vector<32x128xf32>, vector<32x128xf32> -> vector<96x128xf32>
    %c0_39 = arith.constant 0 : index
    %c0_40 = arith.constant 0 : index
    %92 = vector.load %arg6[%c0_39, %c0_40] : memref<32x96xf32, #tpu.memory_space<vmem>>, vector<32x96xf32>
    %cst_41 = arith.constant dense<0.000000e+00> : vector<32x128xf32>
    %93 = tpu.matmul %92, %91, %cst_41 {dimension_numbers = #tpu.dot_dimension_numbers<[1], [0], [0], [1], [0, 0, 1, 1], [], []>} : vector<32x96xf32>, vector<96x128xf32>, vector<32x128xf32> -> vector<32x128xf32>
    %c0_42 = arith.constant 0 : index
    %c0_43 = arith.constant 0 : index
    %94 = vector.load %arg7[%c0_42, %c0_43] : memref<32x1xf32, #tpu.memory_space<vmem>>, vector<32x1xf32>
    %95 = vector.broadcast %94 : vector<32x1xf32> to vector<32x128xf32>
    %96 = arith.addf %93, %95 : vector<32x128xf32>
    %97 = arith.maximumf %51, %54 : vector<32x128xf32>
    %98 = arith.addf %96, %97 : vector<32x128xf32>
    %c0_44 = arith.constant 0 : index
    %c0_45 = arith.constant 0 : index
    %99 = vector.load %arg15[%c0_44, %c0_45] : memref<32x128xf32, #tpu.memory_space<vmem>>, vector<32x128xf32>
    tpu.vector_store %arg15[%c0_44, %c0_45], %98 {strides = array<i32>} : memref<32x128xf32, #tpu.memory_space<vmem>>, vector<32x128xf32>,
    return
  }
  func.func @transform_0(%arg0: i32) -> (i32, i32) {
    %c0_i32 = arith.constant 0 : i32
    %c0_i32_0 = arith.constant 0 : i32
    %c0_i32_1 = arith.constant 0 : i32
    return %c0_i32, %c0_i32_0 : i32, i32
  }
  func.func @transform_1(%arg0: i32) -> (i32, i32) {
    %c0_i32 = arith.constant 0 : i32
    %c0_i32_0 = arith.constant 0 : i32
    %c0_i32_1 = arith.constant 0 : i32
    return %c0_i32, %c0_i32_0 : i32, i32
  }
  func.func @transform_2(%arg0: i32) -> (i32, i32) {
    %c0_i32 = arith.constant 0 : i32
    %c0_i32_0 = arith.constant 0 : i32
    %c0_i32_1 = arith.constant 0 : i32
    return %c0_i32, %c0_i32_0 : i32, i32
  }
  func.func @transform_3(%arg0: i32) -> (i32, i32) {
    %c0_i32 = arith.constant 0 : i32
    %c0_i32_0 = arith.constant 0 : i32
    %c0_i32_1 = arith.constant 0 : i32
    return %c0_i32, %c0_i32_0 : i32, i32
  }
  func.func @transform_4(%arg0: i32) -> (i32, i32) {
    %c0_i32 = arith.constant 0 : i32
    %c0_i32_0 = arith.constant 0 : i32
    %c0_i32_1 = arith.constant 0 : i32
    return %c0_i32, %c0_i32_0 : i32, i32
  }
  func.func @transform_5(%arg0: i32) -> (i32, i32) {
    %c0_i32 = arith.constant 0 : i32
    %c0_i32_0 = arith.constant 0 : i32
    %c0_i32_1 = arith.constant 0 : i32
    return %c0_i32, %c0_i32_0 : i32, i32
  }
  func.func @transform_6(%arg0: i32) -> (i32, i32) {
    %c0_i32 = arith.constant 0 : i32
    %c0_i32_0 = arith.constant 0 : i32
    %c0_i32_1 = arith.constant 0 : i32
    return %c0_i32, %c0_i32_0 : i32, i32
  }
  func.func @transform_7(%arg0: i32) -> (i32, i32) {
    %c0_i32 = arith.constant 0 : i32
    %c0_i32_0 = arith.constant 0 : i32
    %c0_i32_1 = arith.constant 0 : i32
    return %c0_i32, %c0_i32_0 : i32, i32
  }
  func.func @transform_8(%arg0: i32) -> (i32, i32) {
    %c0_i32 = arith.constant 0 : i32
    %c0_i32_0 = arith.constant 0 : i32
    %c0_i32_1 = arith.constant 0 : i32
    return %c0_i32, %c0_i32_0 : i32, i32
  }
  func.func @transform_9(%arg0: i32) -> (i32, i32) {
    %c0_i32 = arith.constant 0 : i32
    %c0_i32_0 = arith.constant 0 : i32
    %c0_i32_1 = arith.constant 0 : i32
    return %c0_i32, %c0_i32_0 : i32, i32
  }
  func.func @transform_10(%arg0: i32) -> (i32, i32) {
    %c0_i32 = arith.constant 0 : i32
    %c0_i32_0 = arith.constant 0 : i32
    %c0_i32_1 = arith.constant 0 : i32
    return %c0_i32, %c0_i32_0 : i32, i32
  }
  func.func @transform_11(%arg0: i32) -> (i32, i32) {
    %c0_i32 = arith.constant 0 : i32
    %c0_i32_0 = arith.constant 0 : i32
    %c0_i32_1 = arith.constant 0 : i32
    return %c0_i32, %c0_i32_0 : i32, i32
  }
  func.func @transform_12(%arg0: i32) -> (i32, i32) {
    %c0_i32 = arith.constant 0 : i32
    %c0_i32_0 = arith.constant 0 : i32
    %c0_i32_1 = arith.constant 0 : i32
    return %c0_i32, %c0_i32_0 : i32, i32
  }
  func.func @transform_13(%arg0: i32) -> (i32, i32) {
    %c0_i32 = arith.constant 0 : i32
    %c0_i32_0 = arith.constant 0 : i32
    %c0_i32_1 = arith.constant 0 : i32
    return %c0_i32, %c0_i32_0 : i32, i32
  }
  func.func @transform_14(%arg0: i32) -> (i32, i32) {
    %c0_i32 = arith.constant 0 : i32
    %c0_i32_0 = arith.constant 0 : i32
    %c0_i32_1 = arith.constant 0 : i32
    return %c0_i32, %c0_i32_0 : i32, i32
  }
}

</mosaic_0001>

<bundles_post_ra>
// kernel: head_block_forward.1
= control target key start
LH: loop header
LB: loop body
LE: loop exit
PB: predicated region body
PF: predicated region fallthrough
CT: control target
= control target key end

     0   :  { %v882_v0 = vmov 0   ;;  %s883_s29 = smov 1   ;;  %s884_s20 = smov 127   ;;  %v81_v18 = vlaneseq  ;;  %vm329_vm0 = vcmask 785408   ;;  %s1251_s2 = inlined_call_operand.vmem [shape: f32[32,1], index: 2, kind: input, shape index: {}]   ;;  %s1252_s1 = inlined_call_operand.vmem [shape: f32[32,1], index: 1, kind: input, shape index: {}]   ;;  %s1253_s3 = inlined_call_operand.vmem [shape: f32[32,1], index: 3, kind: input, shape index: {}]   ;;  %s1254_s0 = inlined_call_operand.vmem [shape: f32[1,128], index: 0, kind: input, shape index: {}]   ;;  %s1255_s11 = inlined_call_operand.vmem [shape: f32[1,128], index: 11, kind: input, shape index: {}]   ;;  %s1256_s12 = inlined_call_operand.vmem [shape: f32[1,128], index: 12, kind: input, shape index: {}]   ;;  %s1257_s13 = inlined_call_operand.vmem [shape: f32[1,128], index: 13, kind: input, shape index: {}]   ;;  %s1258_s7 = inlined_call_operand.vmem [shape: f32[32,1], index: 7, kind: input, shape index: {}]   ;;  %s1259_s8 = inlined_call_operand.vmem [shape: f32[32,1], index: 8, kind: input, shape index: {}]   ;;  %s1260_s4 = inlined_call_operand.vmem [shape: f32[32,96], index: 4, kind: input, shape index: {}]   ;;  %s1261_s9 = inlined_call_operand.vmem [shape: f32[32,1], index: 9, kind: input, shape index: {}]   ;;  %s1262_s10 = inlined_call_operand.vmem [shape: f32[32,1], index: 10, kind: input, shape index: {}]   ;;  %s1263_s6 = inlined_call_operand.vmem [shape: f32[32,1], index: 6, kind: input, shape index: {}]   ;;  %s1264_s5 = inlined_call_operand.vmem [shape: f32[32,96], index: 5, kind: input, shape index: {}]   ;;  %s1265_s14 = inlined_call_operand.vmem [shape: f32[32,128], index: 14, kind: output, shape index: {}]  }
   0x1   :  { %865 = vset.pattern.permute.xlu1 %v882_v0  ;;  %864 = vset.pattern.permute.xlu0 %v882_v0  ;;  %v89_v1 = vld [vmem:[%s1251_s2] sm:$0xff]  ;;  %v90_v3 = vld [vmem:[%s1251_s2 + $0x8] sm:$0xff]  ;;  %v59_v7 = vld [vmem:[%s1252_s1 + $0x10] sm:$0xff] }
   0x2   :  { %v57_v2 = vld [vmem:[%s1252_s1] sm:$0xff]  ;;  %95 = vperm.xlu1 %865, %v89_v1   ;;  %v58_v4 = vld [vmem:[%s1252_s1 + $0x8] sm:$0xff]  ;;  %v91_v9 = vld [vmem:[%s1251_s2 + $0x10] sm:$0xff]  ;;  %v82_v21 = vshrl.u32 %v81_v18, 7 }
   0x3   :  { %63 = vperm.xlu0 %864, %v57_v2   ;;  %v128_v5 = vld [vmem:[%s1253_s3 + $0x8] sm:$0xff]  ;;  %v127_v6 = vld [vmem:[%s1253_s3] sm:$0xff]  ;;  %v60_v10 = vld [vmem:[%s1252_s1 + $0x18] sm:$0xff] }
   0x4   :  { %v50_v8 = vld [vmem:[%s1254_s0] sm:$0x1]  ;;  %v92_v11 = vld [vmem:[%s1251_s2 + $0x18] sm:$0xff]  ;;  %v129_v13 = vld [vmem:[%s1253_s3 + $0x10] sm:$0xff]  ;;  %v1007_v26 = vsub.s32 0, %v82_v21 }
   0x5   :  { %v130_v12 = vld [vmem:[%s1253_s3 + $0x18] sm:$0xff]  ;;  %v1004_v22 = vld [vmem:[%s1255_s11] sm:$0x1] }
   0x6   :  { %100 = vperm.xlu1 %865, %v90_v3   ;;  %v117_v30 = vrot.slane %v50_v8, %v1007_v26  ;;  %v1014_v31 = vld [vmem:[%s1256_s12] sm:$0x1] }
   0x7   :  { %68 = vperm.xlu0 %864, %v58_v4   ;;  %v1021_v52 = vld [vmem:[%s1257_s13] ss:$0 sm:$0xff] }
   0xa   :  { %138 = vperm.xlu1 %865, %v128_v5  }
   0xb   :  { %133 = vperm.xlu0 %864, %v127_v6  }
   0xe   :  { %73 = vperm.xlu1 %865, %v59_v7  }
   0xf   :  { %51 = vrot.lane.b32.xlu0 %v50_v8, %s883_s29 }
  0x12   :  { %105 = vperm.xlu1 %865, %v91_v9  }
  0x13   :  { %78 = vperm.xlu0 %864, %v60_v10  }
  0x16   :  { %54 = vrot.lane.b32.xlu1 %v50_v8, %s884_s20 }
  0x17   :  { %110 = vperm.xlu0 %864, %v92_v11  }
  0x1a   :  { %148 = vperm.xlu1 %865, %v130_v12  }
  0x1b   :  { %143 = vperm.xlu0 %864, %v129_v13  }
  0x81   :  { %v96_v14 = vpop.permute.xlu1 %95 }
  0x82   :  { %v64_v15 = vpop.permute.xlu0 %63  ;;  %v119_v37 = vmul.f32 %v117_v30, %v96_v14 }
  0x85   :  { %v101_v16 = vpop.permute.xlu1 %100 }
  0x86   :  { %v69_v17 = vpop.permute.xlu0 %68  ;;  %v120_v38 = vmul.f32 %v117_v30, %v101_v16 }
  0x89   :  { %v139_v19 = vpop.permute.xlu1 %138 }
  0x8a   :  { %v134_v20 = vpop.permute.xlu0 %133 }
  0x8d   :  { %v74_v23 = vpop.permute.xlu1 %73 }
  0x8e   :  { %v52_v24 = vpop.permute.xlu0 %51 }
  0x8f   :  { %v53_v25 = vmul.f32 %v52_v24, %v1004_v22 }
  0x91   :  { %v84_v27 = vrot.slane %v53_v25, %v1007_v26  ;;  %v106_v28 = vpop.permute.xlu1 %105 }
  0x92   :  { %v79_v29 = vpop.permute.xlu0 %78  ;;  %v121_v40 = vmul.f32 %v117_v30, %v106_v28 }
  0x93   :  { %v86_v34 = vmul.f32 %v84_v27, %v69_v17  ;;  %v85_v35 = vmul.f32 %v84_v27, %v64_v15  ;;  %v87_v39 = vmul.f32 %v84_v27, %v74_v23  ;;  %v88_v43 = vmul.f32 %v84_v27, %v79_v29 }
  0x95   :  { %v55_v32 = vpop.permute.xlu1 %54  ;;  %v124_v46 = vadd.f32 %v120_v38, %v86_v34  ;;  %v123_v47 = vadd.f32 %v119_v37, %v85_v35  ;;  %v125_v53 = vadd.f32 %v121_v40, %v87_v39  ;;  %v163_v34 = vld [vmem:[%s1258_s7] sm:$0xff]  ;;  %v164_v38 = vld [vmem:[%s1258_s7 + $0x8] sm:$0xff]  ;;  %v165_v39 = vld [vmem:[%s1258_s7 + $0x10] sm:$0xff] }
  0x96   :  { %v111_v33 = vpop.permute.xlu0 %110  ;;  %v56_v36 = vmul.f32 %v55_v32, %v1014_v31 }
  0x97   :  { %v122_v42 = vmul.f32 %v117_v30, %v111_v33 }
  0x98   :  { %v154_v41 = vrot.slane %v56_v36, %v1007_v26 }
  0x99   :  { %v149_v44 = vpop.permute.xlu1 %148  ;;  %v126_v54 = vadd.f32 %v122_v42, %v88_v43  ;;  %v166_v43 = vld [vmem:[%s1258_s7 + $0x18] sm:$0xff] }
  0x9a   :  { %v144_v45 = vpop.permute.xlu0 %143  ;;  %v158_v48 = vmul.f32 %v154_v41, %v149_v44  ;;  %v156_v50 = vmul.f32 %v154_v41, %v139_v19  ;;  %v155_v51 = vmul.f32 %v154_v41, %v134_v20 }
  0x9b   :  { %v157_v49 = vmul.f32 %v154_v41, %v144_v45 }
  0x9c   :  { %v1023_v55 = vadd.f32 %v156_v50, %v124_v46  ;;  %v1025_v56 = vadd.f32 %v155_v51, %v123_v47  ;;  %v1027_v57 = vadd.f32 %v158_v48, %v126_v54  ;;  %v169_v48 = vld [vmem:[%s1259_s8 + $0x10] sm:$0xff]  ;;  %v168_v54 = vld [vmem:[%s1259_s8 + $0x8] sm:$0xff] }
  0x9d   :  { %v1029_v58 = vadd.f32 %v157_v49, %v125_v53  ;;  %v167_v49 = vld [vmem:[%s1259_s8] sm:$0xff] }
  0x9e   :  { %v178_v59 = vmul.f32 %v1021_v52, %v1023_v55  ;;  %v177_v60 = vmul.f32 %v1021_v52, %v1025_v56  ;;  %v180_v62 = vmul.f32 %v1021_v52, %v1027_v57 }
  0x9f   :  { %v179_v61 = vmul.f32 %v1021_v52, %v1029_v58 }
  0xa0   :  { %183 = vadd.xlane.f32.xlu1 %v178_v59  ;;  %181 = vadd.xlane.f32.xlu0 %v177_v60  ;;  %v193_v0 = vmul.f32 %v177_v60, %v177_v60  ;;  %v194_v1 = vmul.f32 %v178_v59, %v178_v59  ;;  %v196_v2 = vmul.f32 %v180_v62, %v180_v62 }
  0xa1   :  { %v195_v63 = vmul.f32 %v179_v61, %v179_v61 }
  0xa4   :  { %185 = vadd.xlane.f32.xlu1 %v179_v61  ;;  %187 = vadd.xlane.f32.xlu0 %v180_v62  ;;  %v170_v61 = vld [vmem:[%s1259_s8 + $0x18] sm:$0xff] }
  0xa8   :  { %201 = vadd.xlane.f32.xlu1 %v195_v63  ;;  %197 = vadd.xlane.f32.xlu0 %v193_v0 }
  0xac   :  { %199 = vadd.xlane.f32.xlu0 %v194_v1 }
  0xb0   :  { %203 = vadd.xlane.f32.xlu0 %v196_v2 }
 0x12d   :  { %v184_v3 = vpop.xlane.xlu1 %183  ;;  %v182_v4 = vpop.xlane.xlu0 %181 }
 0x12e   :  { %v189_v7 = vmul.f32 0.03125, %v182_v4  ;;  %v190_v9 = vmul.f32 0.03125, %v184_v3 }
 0x130   :  { %v209_v12 = vmul.f32 %v189_v7, %v189_v7  ;;  %v210_v18 = vmul.f32 %v190_v9, %v190_v9 }
 0x131   :  { %v186_v5 = vpop.xlane.xlu1 %185  ;;  %v188_v6 = vpop.xlane.xlu0 %187 }
 0x132   :  { %v191_v8 = vmul.f32 0.03125, %v186_v5  ;;  %v192_v20 = vmul.f32 0.03125, %v188_v6 }
 0x134   :  { %v211_v13 = vmul.f32 %v191_v8, %v191_v8  ;;  %v212_v28 = vmul.f32 %v192_v20, %v192_v20 }
 0x135   :  { %v202_v10 = vpop.xlane.xlu1 %201  ;;  %v198_v11 = vpop.xlane.xlu0 %197 }
 0x136   :  { %v207_v14 = vmul.f32 0.03125, %v202_v10  ;;  %v205_v15 = vmul.f32 0.03125, %v198_v11 }
 0x138   :  { %v215_v16 = vsub.f32 %v207_v14, %v211_v13  ;;  %v213_v17 = vsub.f32 %v205_v15, %v209_v12 }
 0x139   :  { %v200_v19 = vpop.xlane.xlu0 %199 }
 0x13a   :  { %v219_v21 = vadd.f32 1e-05, %v215_v16  ;;  %v217_v23 = vadd.f32 1e-05, %v213_v17  ;;  %v206_v24 = vmul.f32 0.03125, %v200_v19  ;;  %v1081_v19 = vrot.slane %v1004_v22, %v1007_v26 }
 0x13c   :  { %v214_v25 = vsub.f32 %v206_v24, %v210_v18  ;;  %866 = vrsqrt.f32 %v217_v23  ;;  %v1085_v23 = vrot.slane %v1014_v31, %v1007_v26 }
 0x13d   :  { %v204_v27 = vpop.xlane.xlu0 %203  ;;  %868 = vrsqrt.f32 %v219_v21 }
 0x13e   :  { %v218_v29 = vadd.f32 1e-05, %v214_v25  ;;  %v208_v30 = vmul.f32 0.03125, %v204_v27 }
 0x140   :  { %870 = vrsqrt.f32 %v218_v29  ;;  %v216_v32 = vsub.f32 %v208_v30, %v212_v28 }
 0x142   :  { %v220_v33 = vadd.f32 1e-05, %v216_v32 }
 0x144   :  { %872 = vrsqrt.f32 %v220_v33 }
 0x146   :  { %v867_v35 = vpop.eup %866 }
 0x147   :  { %v869_v36 = vpop.eup %868  ;;  %v225_v37 = vmul.f32 %v867_v35, %v163_v34 }
 0x148   :  { %v227_v42 = vmul.f32 %v869_v36, %v165_v39 }
 0x149   :  { %239 = vperm.xlu1 %865, %v225_v37   ;;  %v229_v47 = vmul.f32 %v225_v37, %v189_v7 }
 0x14a   :  { %v871_v40 = vpop.eup %870  ;;  %v231_v46 = vmul.f32 %v227_v42, %v191_v8 }
 0x14b   :  { %v226_v41 = vmul.f32 %v871_v40, %v164_v38  ;;  %v233_v51 = vsub.f32 %v167_v49, %v229_v47 }
 0x14c   :  { %v235_v50 = vsub.f32 %v169_v48, %v231_v46  ;;  %v328_v46 = vld [vmem:[%s1260_s4 + $0x18] sm:$0xff] }
 0x14d   :  { %244 = vperm.xlu0 %864, %v226_v41   ;;  %v230_v53 = vmul.f32 %v226_v41, %v190_v9 }
 0x14e   :  { %v873_v44 = vpop.eup %872 }
 0x14f   :  { %v228_v45 = vmul.f32 %v873_v44, %v166_v43  ;;  %v234_v59 = vsub.f32 %v168_v54, %v230_v53  ;;  %v326_v44 = vld [vmem:[%s1260_s4 + $0x8] sm:$0xff] }
 0x151   :  { %249 = vperm.xlu0 %864, %v227_v42   ;;  %254 = vperm.xlu1 %865, %v228_v45   ;;  %v232_v60 = vmul.f32 %v228_v45, %v192_v20  ;;  %v327_v45 = vld [vmem:[%s1260_s4 + $0x10] sm:$0xff] }
 0x153   :  { %v236_v62 = vsub.f32 %v170_v61, %v232_v60 }
 0x155   :  { %273 = vperm.xlu0 %864, %v235_v50   ;;  %263 = vperm.xlu1 %865, %v233_v51  }
 0x159   :  { %268 = vperm.xlu1 %865, %v234_v59  }
 0x15d   :  { %278 = vperm.xlu1 %865, %v236_v62  }
 0x1c8   :  { %v240_v63 = vpop.permute.xlu1 %239 }
 0x1c9   :  { %v257_v3 = vmul.f32 %v240_v63, %v1025_v56 }
 0x1cc   :  { %v245_v0 = vpop.permute.xlu0 %244 }
 0x1cd   :  { %v258_v8 = vmul.f32 %v245_v0, %v1023_v55 }
 0x1d0   :  { %v255_v1 = vpop.permute.xlu1 %254  ;;  %v250_v2 = vpop.permute.xlu0 %249 }
 0x1d1   :  { %v259_v6 = vmul.f32 %v250_v2, %v1029_v58  ;;  %v260_v13 = vmul.f32 %v255_v1, %v1027_v57  ;;  %v325_v57 = vld [vmem:[%s1260_s4] sm:$0xff] }
 0x1d2   :  { %777 = vmatprep.mubr.msk.f32.mxu0 %vm329_vm0, %v325_v57 }
 0x1d4   :  { %v264_v4 = vpop.permute.xlu1 %263  ;;  %v274_v5 = vpop.permute.xlu0 %273 }
 0x1d5   :  { %v281_v7 = vadd.f32 %v264_v4, %v257_v3  ;;  %v283_v10 = vadd.f32 %v274_v5, %v259_v6 }
 0x1d7   :  { %v285_v9 = vmax.f32 %v281_v7, 0.0  ;;  %v287_v14 = vmax.f32 %v283_v10, 0.0 }
 0x1d8   :  { %v269_v11 = vpop.permute.xlu1 %268 }
 0x1d9   :  { %v282_v12 = vadd.f32 %v269_v11, %v258_v8  ;;  %289 = vrot.lane.b32.xlu0 %v285_v9, %s883_s29 }
 0x1db   :  { %v286_v15 = vmax.f32 %v282_v12, 0.0 }
 0x1dc   :  { %v279_v16 = vpop.permute.xlu1 %278 }
 0x1dd   :  { %v284_v17 = vadd.f32 %v279_v16, %v260_v13  ;;  %291 = vrot.lane.b32.xlu1 %v286_v15, %s883_s29  ;;  %293 = vrot.lane.b32.xlu0 %v287_v14, %s883_s29  ;;  %v821_v56 = vpack.c.bf16 %v286_v15, %v285_v9 }
 0x1df   :  { %v288_v58 = vmax.f32 %v284_v17, 0.0 }
 0x1e1   :  { %295 = vrot.lane.b32.xlu1 %v288_v58, %s883_s29  ;;  %307 = vrot.lane.b32.xlu0 %v285_v9, %s884_s20  ;;  %v825_v55 = vpack.c.bf16 %v288_v58, %v287_v14 }
 0x1e5   :  { %309 = vrot.lane.b32.xlu1 %v286_v15, %s884_s20  ;;  %311 = vrot.lane.b32.xlu0 %v287_v14, %s884_s20 }
 0x1e9   :  { %313 = vrot.lane.b32.xlu1 %v288_v58, %s884_s20 }
 0x24b   :  { %v290_v18 = vpop.permute.xlu0 %289 }
 0x24c   :  { %v1088_v24 = vmul.f32 %v1081_v19, %v290_v18 }
 0x24f   :  { %v292_v20 = vpop.permute.xlu1 %291  ;;  %v294_v21 = vpop.permute.xlu0 %293 }
 0x250   :  { %v1091_v25 = vmul.f32 %v1081_v19, %v292_v20  ;;  %v1096_v22 = vmul.f32 %v1081_v19, %v294_v21 }
 0x252   :  { %v813_v27 = vpack.c.bf16 %v1091_v25, %v1088_v24 }
 0x253   :  { %v296_v28 = vpop.permute.xlu1 %295  ;;  %v308_v29 = vpop.permute.xlu0 %307 }
 0x254   :  { %v1099_v30 = vmul.f32 %v1081_v19, %v296_v28  ;;  %v1102_v26 = vmul.f32 %v1085_v23, %v308_v29  ;;  %814 = vmatprep.subr.bf16.mxu0 %v813_v27  ;;  %v428_v28 = vld [vmem:[%s1261_s9 + $0x8] sm:$0xff] }
 0x255   :  { %816 = vmatpush3.bf16.msra.mxu0 %v813_v27 }
 0x256   :  { %v817_v31 = vpack.c.bf16 %v1099_v30, %v1096_v22  ;;  %v696_v32 = vmax.f32 %v1088_v24, %v1102_v26 }
 0x257   :  { %v310_v33 = vpop.permute.xlu1 %309  ;;  %v312_v34 = vpop.permute.xlu0 %311 }
 0x258   :  { %v1109_v35 = vmul.f32 %v1085_v23, %v310_v33  ;;  %v1112_v36 = vmul.f32 %v1085_v23, %v312_v34  ;;  %818 = vmatprep.subr.bf16.mxu0 %v817_v31  ;;  %v427_v34 = vld [vmem:[%s1261_s9] sm:$0xff] }
 0x259   :  { %820 = vmatpush3.bf16.msra.mxu0 %v817_v31 }
 0x25a   :  { %v697_v37 = vmax.f32 %v1091_v25, %v1109_v35  ;;  %v698_v38 = vmax.f32 %v1096_v22, %v1112_v36  ;;  %822 = vmatprep.subr.bf16.mxu0 %v821_v56  ;;  %v829_v42 = vpack.c.bf16 %v1109_v35, %v1102_v26 }
 0x25b   :  { %v314_v39 = vpop.permute.xlu1 %313 }
 0x25c   :  { %v1119_v40 = vmul.f32 %v1085_v23, %v314_v39  ;;  %v429_v39 = vld [vmem:[%s1261_s9 + $0x10] sm:$0xff] }
 0x25d   :  { %824 = vmatpush3.bf16.msra.mxu0 %v821_v56 }
 0x25e   :  { %v699_v41 = vmax.f32 %v1099_v30, %v1119_v40  ;;  %826 = vmatprep.subr.bf16.mxu0 %v825_v55  ;;  %v833_v43 = vpack.c.bf16 %v1119_v40, %v1112_v36 }
 0x261   :  { %828 = vmatpush3.bf16.msra.mxu0 %v825_v55 }
 0x262   :  { %830 = vmatprep.subr.bf16.mxu0 %v829_v42 }
 0x265   :  { %832 = vmatpush3.bf16.msra.mxu0 %v829_v42 }
 0x266   :  { %834 = vmatprep.subr.bf16.mxu0 %v833_v43 }
 0x269   :  { %836 = vmatpush3.bf16.msra.mxu0 %v833_v43 }
 0x26c   :  { %778 = vmatmul.mubr.msk.f32.vlgmr.msra.gmra.mrb[0].mxu0 %vm329_vm0, %v326_v44 }
 0x26d   :  { %780 = vmatprep.mubr.msk.f32.mxu0 %vm329_vm0, %v327_v45 }
 0x270   :  { %781 = vmatmul.mubr.msk.f32.gmra.mrb[2].mxu0 %vm329_vm0, %v328_v46 }
 0x33f   :  { %v1139_v47 = vpop.f32.mrb[0].mxu0 }
 0x340   :  { %v1141_v48 = vpop.f32.mrb[1].mxu0  ;;  %v436_v49 = vmul.f32 %v1139_v47, %v1021_v52 }
 0x341   :  { %v435_v50 = vmul.f32 %v1021_v52, %v1141_v48 }
 0x342   :  { %441 = vadd.xlane.f32.xlu1 %v436_v49  ;;  %v452_v59 = vmul.f32 %v436_v49, %v436_v49  ;;  %v432_v49 = vld [vmem:[%s1262_s10 + $0x8] sm:$0xff] }
 0x343   :  { %439 = vadd.xlane.f32.xlu0 %v435_v50  ;;  %v1147_v51 = vpop.f32.mrb[2].mxu0  ;;  %v451_v61 = vmul.f32 %v435_v50, %v435_v50  ;;  %v433_v50 = vld [vmem:[%s1262_s10 + $0x10] sm:$0xff] }
 0x344   :  { %v1149_v53 = vpop.f32.mrb[3].mxu0  ;;  %v438_v62 = vmul.f32 %v1147_v51, %v1021_v52 }
 0x345   :  { %v437_v54 = vmul.f32 %v1021_v52, %v1149_v53 }
 0x346   :  { %v454_v63 = vmul.f32 %v438_v62, %v438_v62 }
 0x347   :  { %457 = vadd.xlane.f32.xlu0 %v452_v59  ;;  %443 = vadd.xlane.f32.xlu1 %v437_v54  ;;  %v453_v60 = vmul.f32 %v437_v54, %v437_v54 }
 0x34b   :  { %455 = vadd.xlane.f32.xlu0 %v451_v61  ;;  %459 = vadd.xlane.f32.xlu1 %v453_v60  ;;  %v430_v61 = vld [vmem:[%s1261_s9 + $0x18] sm:$0xff] }
 0x34f   :  { %445 = vadd.xlane.f32.xlu0 %v438_v62 }
 0x353   :  { %461 = vadd.xlane.f32.xlu0 %v454_v63 }
 0x3cf   :  { %v442_v0 = vpop.xlane.xlu1 %441 }
 0x3d0   :  { %v440_v1 = vpop.xlane.xlu0 %439  ;;  %v448_v2 = vmul.f32 0.03125, %v442_v0 }
 0x3d1   :  { %v447_v6 = vmul.f32 0.03125, %v440_v1  ;;  %v431_v1 = vld [vmem:[%s1262_s10] sm:$0xff] }
 0x3d2   :  { %v468_v5 = vmul.f32 %v448_v2, %v448_v2 }
 0x3d3   :  { %v467_v13 = vmul.f32 %v447_v6, %v447_v6 }
 0x3d4   :  { %v458_v3 = vpop.xlane.xlu0 %457  ;;  %v444_v4 = vpop.xlane.xlu1 %443 }
 0x3d5   :  { %v464_v7 = vmul.f32 0.03125, %v458_v3  ;;  %v449_v8 = vmul.f32 0.03125, %v444_v4  ;;  %v434_v4 = vld [vmem:[%s1262_s10 + $0x18] sm:$0xff] }
 0x3d7   :  { %v472_v9 = vsub.f32 %v464_v7, %v468_v5  ;;  %v469_v10 = vmul.f32 %v449_v8, %v449_v8 }
 0x3d8   :  { %v456_v11 = vpop.xlane.xlu0 %455  ;;  %v460_v12 = vpop.xlane.xlu1 %459 }
 0x3d9   :  { %v476_v14 = vadd.f32 1e-05, %v472_v9  ;;  %v463_v15 = vmul.f32 0.03125, %v456_v11  ;;  %v465_v52 = vmul.f32 0.03125, %v460_v12 }
 0x3db   :  { %874 = vrsqrt.f32 %v476_v14  ;;  %v471_v16 = vsub.f32 %v463_v15, %v467_v13  ;;  %v473_v17 = vsub.f32 %v465_v52, %v469_v10 }
 0x3dc   :  { %v446_v56 = vpop.xlane.xlu0 %445 }
 0x3dd   :  { %v475_v58 = vadd.f32 1e-05, %v471_v16  ;;  %v477_v55 = vadd.f32 1e-05, %v473_v17  ;;  %v450_v57 = vmul.f32 0.03125, %v446_v56 }
 0x3df   :  { %876 = vrsqrt.f32 %v475_v58  ;;  %v470_v20 = vmul.f32 %v450_v57, %v450_v57 }
 0x3e0   :  { %878 = vrsqrt.f32 %v477_v55  ;;  %v462_v18 = vpop.xlane.xlu0 %461 }
 0x3e1   :  { %v466_v21 = vmul.f32 0.03125, %v462_v18 }
 0x3e3   :  { %v474_v27 = vsub.f32 %v466_v21, %v470_v20 }
 0x3e5   :  { %v875_v29 = vpop.eup %874  ;;  %v478_v31 = vadd.f32 1e-05, %v474_v27  ;;  %v571_v27 = vld [vmem:[%s1264_s5] sm:$0xff] }
 0x3e6   :  { %v484_v33 = vmul.f32 %v875_v29, %v428_v28  ;;  %807 = vmatprep.mubr.msk.f32.mxu1 %vm329_vm0, %v571_v27  ;;  %v577_v28 = vld [vmem:[%s1263_s6 + $0x10] sm:$0xff]  ;;  %v578_v29 = vld [vmem:[%s1263_s6 + $0x18] sm:$0xff] }
 0x3e7   :  { %880 = vrsqrt.f32 %v478_v31 }
 0x3e8   :  { %502 = vperm.xlu0 %864, %v484_v33   ;;  %v488_v45 = vmul.f32 %v484_v33, %v448_v2 }
 0x3e9   :  { %v877_v42 = vpop.eup %876 }
 0x3ea   :  { %v879_v43 = vpop.eup %878  ;;  %v483_v44 = vmul.f32 %v877_v42, %v427_v34  ;;  %v492_v59 = vsub.f32 %v432_v49, %v488_v45 }
 0x3eb   :  { %v485_v46 = vmul.f32 %v879_v43, %v429_v39 }
 0x3ec   :  { %497 = vperm.xlu1 %865, %v483_v44   ;;  %v487_v0 = vmul.f32 %v483_v44, %v447_v6 }
 0x3ed   :  { %507 = vperm.xlu0 %864, %v485_v46   ;;  %v489_v54 = vmul.f32 %v485_v46, %v449_v8 }
 0x3ee   :  { %v491_v2 = vsub.f32 %v431_v1, %v487_v0 }
 0x3ef   :  { %v493_v60 = vsub.f32 %v433_v50, %v489_v54 }
 0x3f0   :  { %526 = vperm.xlu1 %865, %v492_v59  }
 0x3f1   :  { %v881_v62 = vpop.eup %880  ;;  %531 = vperm.xlu0 %864, %v493_v60  }
 0x3f2   :  { %v486_v63 = vmul.f32 %v881_v62, %v430_v61 }
 0x3f4   :  { %512 = vperm.xlu1 %865, %v486_v63   ;;  %v490_v3 = vmul.f32 %v486_v63, %v450_v57 }
 0x3f6   :  { %v494_v5 = vsub.f32 %v434_v4, %v490_v3  ;;  %v573_v3 = vld [vmem:[%s1264_s5 + $0x10] sm:$0xff] }
 0x3f8   :  { %521 = vperm.xlu1 %865, %v491_v2   ;;  %v572_v2 = vld [vmem:[%s1264_s5 + $0x8] sm:$0xff] }
 0x3fc   :  { %536 = vperm.xlu1 %865, %v494_v5  }
 0x467   :  { %v503_v7 = vpop.permute.xlu0 %502 }
 0x468   :  { %v516_v9 = vmul.f32 %v1139_v47, %v503_v7 }
 0x46b   :  { %v498_v8 = vpop.permute.xlu1 %497 }
 0x46c   :  { %v508_v11 = vpop.permute.xlu0 %507  ;;  %v515_v14 = vmul.f32 %v498_v8, %v1141_v48 }
 0x46d   :  { %v517_v16 = vmul.f32 %v508_v11, %v1149_v53  ;;  %v576_v53 = vld [vmem:[%s1263_s6 + $0x8] sm:$0xff] }
 0x46f   :  { %v527_v10 = vpop.permute.xlu1 %526 }
 0x470   :  { %v540_v6 = vadd.f32 %v527_v10, %v516_v9  ;;  %v532_v15 = vpop.permute.xlu0 %531 }
 0x471   :  { %v541_v56 = vadd.f32 %v532_v15, %v517_v16 }
 0x472   :  { %v544_v12 = vmax.f32 %v540_v6, 0.0 }
 0x473   :  { %v513_v13 = vpop.permute.xlu1 %512  ;;  %v545_v20 = vmax.f32 %v541_v56, 0.0 }
 0x474   :  { %549 = vrot.lane.b32.xlu1 %v544_v12, %s883_s29  ;;  %v518_v58 = vmul.f32 %v1147_v51, %v513_v13  ;;  %v575_v51 = vld [vmem:[%s1263_s6] sm:$0xff] }
 0x477   :  { %v522_v52 = vpop.permute.xlu1 %521 }
 0x478   :  { %v539_v17 = vadd.f32 %v522_v52, %v515_v14 }
 0x47a   :  { %v543_v55 = vmax.f32 %v539_v17, 0.0 }
 0x47b   :  { %v537_v57 = vpop.permute.xlu1 %536 }
 0x47c   :  { %v542_v47 = vadd.f32 %v537_v57, %v518_v58  ;;  %547 = vrot.lane.b32.xlu0 %v543_v55, %s883_s29  ;;  %v845_v18 = vpack.c.bf16 %v544_v12, %v543_v55 }
 0x47e   :  { %v546_v21 = vmax.f32 %v542_v47, 0.0 }
 0x480   :  { %551 = vrot.lane.b32.xlu0 %v545_v20, %s883_s29  ;;  %553 = vrot.lane.b32.xlu1 %v546_v21, %s883_s29  ;;  %v849_v48 = vpack.c.bf16 %v546_v21, %v545_v20 }
 0x484   :  { %559 = vrot.lane.b32.xlu0 %v543_v55, %s884_s20  ;;  %561 = vrot.lane.b32.xlu1 %v544_v12, %s884_s20 }
 0x488   :  { %563 = vrot.lane.b32.xlu0 %v545_v20, %s884_s20  ;;  %565 = vrot.lane.b32.xlu1 %v546_v21, %s884_s20 }
 0x48c   :  { %581 = vperm.xlu0 %864, %v575_v51   ;;  %586 = vperm.xlu1 %865, %v576_v53  }
 0x490   :  { %591 = vperm.xlu0 %864, %v577_v28   ;;  %596 = vperm.xlu1 %865, %v578_v29  }
 0x4e6   :  { %v550_v31 = vpop.permute.xlu1 %549 }
 0x4e7   :  { %v556_v34 = vmul.f32 %v550_v31, %v1081_v19 }
 0x4ee   :  { %v548_v33 = vpop.permute.xlu0 %547 }
 0x4ef   :  { %v555_v39 = vmul.f32 %v548_v33, %v1081_v19 }
 0x4f1   :  { %v837_v42 = vpack.c.bf16 %v556_v34, %v555_v39 }
 0x4f2   :  { %v552_v43 = vpop.permute.xlu0 %551  ;;  %v554_v44 = vpop.permute.xlu1 %553 }
 0x4f3   :  { %v557_v45 = vmul.f32 %v552_v43, %v1081_v19  ;;  %v558_v46 = vmul.f32 %v554_v44, %v1081_v19  ;;  %838 = vmatprep.subr.bf16.mxu1 %v837_v42 }
 0x4f4   :  { %840 = vmatpush3.bf16.msra.mxu1 %v837_v42 }
 0x4f5   :  { %v841_v49 = vpack.c.bf16 %v558_v46, %v557_v45 }
 0x4f6   :  { %v560_v50 = vpop.permute.xlu0 %559  ;;  %v562_v54 = vpop.permute.xlu1 %561 }
 0x4f7   :  { %842 = vmatprep.subr.bf16.mxu1 %v841_v49  ;;  %v567_v59 = vmul.f32 %v560_v50, %v1085_v23  ;;  %v568_v60 = vmul.f32 %v562_v54, %v1085_v23 }
 0x4f8   :  { %844 = vmatpush3.bf16.msra.mxu1 %v841_v49 }
 0x4f9   :  { %846 = vmatprep.subr.bf16.mxu1 %v845_v18  ;;  %v853_v63 = vpack.c.bf16 %v568_v60, %v567_v59 }
 0x4fa   :  { %v564_v61 = vpop.permute.xlu0 %563  ;;  %v566_v62 = vpop.permute.xlu1 %565 }
 0x4fb   :  { %v569_v0 = vmul.f32 %v564_v61, %v1085_v23  ;;  %v570_v19 = vmul.f32 %v566_v62, %v1085_v23  ;;  %v574_v23 = vld [vmem:[%s1264_s5 + $0x18] sm:$0xff] }
 0x4fc   :  { %848 = vmatpush3.bf16.msra.mxu1 %v845_v18 }
 0x4fd   :  { %850 = vmatprep.subr.bf16.mxu1 %v849_v48  ;;  %v857_v1 = vpack.c.bf16 %v570_v19, %v569_v0 }
 0x500   :  { %852 = vmatpush3.bf16.msra.mxu1 %v849_v48 }
 0x501   :  { %854 = vmatprep.subr.bf16.mxu1 %v853_v63 }
 0x504   :  { %856 = vmatpush3.bf16.msra.mxu1 %v853_v63 }
 0x505   :  { %858 = vmatprep.subr.bf16.mxu1 %v857_v1 }
 0x508   :  { %860 = vmatpush3.bf16.msra.mxu1 %v857_v1 }
 0x50b   :  { %808 = vmatmul.mubr.msk.f32.vlgmr.msra.gmra.mrb[0].mxu1 %vm329_vm0, %v572_v2  ;;  %v587_v4 = vpop.permute.xlu1 %586  ;;  %v582_v5 = vpop.permute.xlu0 %581 }
 0x50c   :  { %810 = vmatprep.mubr.msk.f32.mxu1 %vm329_vm0, %v573_v3 }
 0x50f   :  { %811 = vmatmul.mubr.msk.f32.gmra.mrb[2].mxu1 %vm329_vm0, %v574_v23  ;;  %v597_v11 = vpop.permute.xlu1 %596  ;;  %v592_v14 = vpop.permute.xlu0 %591 }
 0x5de   :  { %v809_v7 = vpop.f32.mrb[0].mxu1 }
 0x5df   :  { %v683_v8 = vadd.f32 %v809_v7, %v587_v4  ;;  %v677_v9 = vpop.f32.mrb[1].mxu1 }
 0x5e0   :  { %v678_v10 = vadd.f32 %v677_v9, %v582_v5 }
 0x5e1   :  { %v701_v6 = vadd.f32 %v697_v37, %v683_v8 }
 0x5e2   :  { %v700_v12 = vadd.f32 %v696_v32, %v678_v10  ;;  %v812_v13 = vpop.f32.mrb[2].mxu1 }
 0x5e3   :  { %705 = vst [vmem:[%s1265_s14 + $0x8] sm:$0xff] %v701_v6  ;;  %v693_v15 = vadd.f32 %v812_v13, %v597_v11  ;;  %v687_v52 = vpop.f32.mrb[3].mxu1 }
 0x5e4   :  { %704 = vst [vmem:[%s1265_s14] sm:$0xff] %v700_v12  ;;  %v688_v16 = vadd.f32 %v687_v52, %v592_v14 }
 0x5e5   :  { %v703_v25 = vadd.f32 %v699_v41, %v693_v15 }
 0x5e6   :  { %v702_v24 = vadd.f32 %v698_v38, %v688_v16 }
 0x5e7   :  { %707 = vst [vmem:[%s1265_s14 + $0x18] sm:$0xff] %v703_v25 }
 0x5e8   :  { %706 = vst [vmem:[%s1265_s14 + $0x10] sm:$0xff] %v702_v24 }

</bundles_post_ra>
